<compile_context>
chip_gen: v5e
topology: v5e:2x2
jax: 0.10.0
libtpu: 0.0.40
codegen_flags: <defaults>
</compile_context>

<pallas_src>
import jax
import jax.numpy as jnp
from jax.experimental import pallas as pl
from jax.experimental.pallas import tpu as pltpu

GN_GROUPS = 8          # gn_c in the PyTorch source (norm_set == 'gn')
GN_EPS = 1e-5          # PyTorch GroupNorm default eps


def _round_up(x, m):
    return (x + m - 1) // m * m


# ----------------------------------------------------------------------------
# Pallas kernel 1: direct 3x3x3 conv (pad=1, stride=1), grid (N, D)
# ----------------------------------------------------------------------------
def _conv3x3_kernel(x0_ref, x1_ref, x2_ref, w_ref, b_ref, o_ref):
    H = o_ref.shape[2]
    W = o_ref.shape[3]
    Cout = o_ref.shape[4]
    acc = jnp.zeros((H * W, Cout), jnp.float32)
    for kd, xr in enumerate((x0_ref, x1_ref, x2_ref)):
        xs = xr[0, 0]                                    # (H+2, W+2, Cin) in VMEM
        for kh in range(3):
            for kw in range(3):
                a = xs[kh:kh + H, kw:kw + W, :].reshape(H * W, -1)
                acc = acc + jnp.dot(a, w_ref[kd, kh, kw],
                                    preferred_element_type=jnp.float32)
    o_ref[0, 0] = (acc + b_ref[...]).reshape(H, W, Cout)


def conv3d_3x3(x, w, b):
    """x: (N,D,H,W,Cin), w: (3,3,3,Cin,Cout), b: (Cout,) -> (N,D,H,W,Cout)."""
    N, D, H, W, Cin = x.shape
    Cout = w.shape[-1]
    xp = jnp.pad(x.astype(jnp.float32),
                 ((0, 0), (1, 1), (1, 1), (1, 1), (0, 0)))
    Hp, Wp = H + 2, W + 2

    def xspec(k):
        return pl.BlockSpec((1, 1, Hp, Wp, Cin),
                            lambda n, d, k=k: (n, d + k, 0, 0, 0))

    return pl.pallas_call(
        _conv3x3_kernel,
        out_shape=jax.ShapeDtypeStruct((N, D, H, W, Cout), jnp.float32),
        grid=(N, D),
        in_specs=[xspec(0), xspec(1), xspec(2),
                  pl.BlockSpec((3, 3, 3, Cin, Cout),
                               lambda n, d: (0, 0, 0, 0, 0)),
                  pl.BlockSpec((1, Cout), lambda n, d: (0, 0))],
        out_specs=pl.BlockSpec((1, 1, H, W, Cout), lambda n, d: (n, d, 0, 0, 0)),
        compiler_params=pltpu.CompilerParams(
            dimension_semantics=("parallel", "parallel")),
    )(xp, xp, xp, w.astype(jnp.float32),
      b.astype(jnp.float32).reshape(1, Cout))


# ----------------------------------------------------------------------------
# Pallas kernel 2: fused GroupNorm(8) + ReLU on the (N, S, C) view (no transposes)
# ----------------------------------------------------------------------------
def _gn_relu_kernel(x_ref, p_ref, g_ref, b_ref, o_ref):
    x = x_ref[0]                                  # (S, C) f32
    s = x.shape[0]
    p = p_ref[...]                                # (C, C) group-average matrix
    mean = jnp.dot(jnp.sum(x, axis=0, keepdims=True) * (1.0 / s), p,
                   preferred_element_type=jnp.float32)          # (1, C) group mean
    xc = x - mean
    var = jnp.dot(jnp.sum(xc * xc, axis=0, keepdims=True) * (1.0 / s), p,
                  preferred_element_type=jnp.float32)           # (1, C) biased var
    inv = jax.lax.rsqrt(var + GN_EPS)
    o_ref[0] = jnp.maximum(xc * (inv * g_ref[...]) + b_ref[...], 0.0)


def groupnorm_relu(x, gamma, beta):
    """x: (N, S, C) -> GroupNorm(GN_GROUPS) + ReLU, same shape (f32)."""
    N, S, C = x.shape
    G = GN_GROUPS
    assert C % G == 0, "GroupNorm requires channels divisible by GN_GROUPS"
    cg = C // G
    gidx = jnp.arange(C) // cg
    P = (gidx[:, None] == gidx[None, :]).astype(jnp.float32) / float(cg)
    # TODO(synk): two-pass S-tiling (stats pass + apply pass) for volumes whose
    #             (S, C) slab does not fit VMEM (v7x: 64 MiB).
    return pl.pallas_call(
        _gn_relu_kernel,
        out_shape=jax.ShapeDtypeStruct((N, S, C), jnp.float32),
        grid=(N,),
        in_specs=[pl.BlockSpec((1, S, C), lambda n: (n, 0, 0)),
                  pl.BlockSpec((C, C), lambda n: (0, 0)),
                  pl.BlockSpec((1, C), lambda n: (0, 0)),
                  pl.BlockSpec((1, C), lambda n: (0, 0))],
        out_specs=pl.BlockSpec((1, S, C), lambda n: (n, 0, 0)),
        compiler_params=pltpu.CompilerParams(dimension_semantics=("parallel",)),
    )(x.astype(jnp.float32), P,
      gamma.astype(jnp.float32).reshape(1, C),
      beta.astype(jnp.float32).reshape(1, C))


# ----------------------------------------------------------------------------
# Pallas kernel 3: batched small matmul (shared A) -- used by the upsample
# ----------------------------------------------------------------------------
def _bmm_kernel(a_ref, x_ref, o_ref):
    o_ref[0] = jnp.dot(a_ref[...], x_ref[0],
                       preferred_element_type=jnp.float32)


def batched_matmul(a, x):
    """a: (M, K) shared; x: (B, K, L) -> (B, M, L) with out[b] = a @ x[b]."""
    B, K, L = x.shape
    M = a.shape[0]
    return pl.pallas_call(
        _bmm_kernel,
        out_shape=jax.ShapeDtypeStruct((B, M, L), jnp.float32),
        grid=(B,),
        in_specs=[pl.BlockSpec((M, K), lambda b: (0, 0)),
                  pl.BlockSpec((1, K, L), lambda b: (b, 0, 0))],
        out_specs=pl.BlockSpec((1, M, L), lambda b: (b, 0, 0)),
        compiler_params=pltpu.CompilerParams(dimension_semantics=("parallel",)),
    )(a.astype(jnp.float32), x.astype(jnp.float32))


# ----------------------------------------------------------------------------
# Pallas kernel 4: full-K matmul + bias (1x1 conv / seg head)
# ----------------------------------------------------------------------------
def _mm_bias_kernel(a_ref, b_ref, bias_ref, o_ref):
    o_ref[...] = (jnp.dot(a_ref[...], b_ref[...],
                          preferred_element_type=jnp.float32) + bias_ref[...])


def matmul_bias_fullk(a, b, bias, tm=512):
    """a: (M, K), b: (K, Nc), bias: (Nc,) -> (M, Nc), full-K single-step tiles."""
    M, K = a.shape
    Nc = b.shape[1]
    tm = min(tm, _round_up(M, 8))
    Mp = _round_up(M, tm)
    a = a.astype(jnp.float32)
    if Mp != M:
        a = jnp.pad(a, ((0, Mp - M), (0, 0)))
    out = pl.pallas_call(
        _mm_bias_kernel,
        out_shape=jax.ShapeDtypeStruct((Mp, Nc), jnp.float32),
        grid=(Mp // tm,),
        in_specs=[pl.BlockSpec((tm, K), lambda i: (i, 0)),
                  pl.BlockSpec((K, Nc), lambda i: (0, 0)),
                  pl.BlockSpec((1, Nc), lambda i: (0, 0))],
        out_specs=pl.BlockSpec((tm, Nc), lambda i: (i, 0)),
        compiler_params=pltpu.CompilerParams(dimension_semantics=("parallel",)),
    )(a, b.astype(jnp.float32), bias.astype(jnp.float32).reshape(1, Nc))
    return out[:M] if Mp != M else out


def conv3d_1x1(x, w, b):
    """x: (N,D,H,W,Cin), w: (Cin,Cout), b: (Cout,)."""
    N, D, H, W, Cin = x.shape
    Cout = w.shape[-1]
    out = matmul_bias_fullk(x.reshape(N * D * H * W, Cin), w, b)
    return out.reshape(N, D, H, W, Cout)


# ----------------------------------------------------------------------------
# Trilinear upsample, align_corners=True, as two batched Pallas matmuls
# ----------------------------------------------------------------------------
def interp_matrix(di, do):
    if do > 1:
        src = jnp.arange(do, dtype=jnp.float32) * (float(di - 1) / float(do - 1))
    else:
        src = jnp.zeros((do,), jnp.float32)
    lo = jnp.clip(jnp.floor(src), 0.0, float(di - 1)).astype(jnp.int32)
    hi = jnp.minimum(lo + 1, di - 1)
    frac = src - lo.astype(jnp.float32)
    m = ((1.0 - frac)[:, None] * jax.nn.one_hot(lo, di, dtype=jnp.float32)
         + frac[:, None] * jax.nn.one_hot(hi, di, dtype=jnp.float32))
    return m                                                  # (do, di)


def trilinear_upsample(x, size):
    """x: (N,D,H,W,C); size: (Do,Ho,Wo).  mode='trilinear', align_corners=True."""
    N, D, H, W, C = x.shape
    Do, Ho, Wo = (int(s) for s in size)
    Md = interp_matrix(D, Do)                                      # (Do, D)
    Mhw = jnp.kron(interp_matrix(H, Ho), interp_matrix(W, Wo))     # (Ho*Wo, H*W)
    y = batched_matmul(Md, x.reshape(N, D, H * W * C))             # (N, Do, H*W*C)
    z = batched_matmul(Mhw, y.reshape(N * Do, H * W, C))           # (N*Do, Ho*Wo, C)
    return z.reshape(N, Do, Ho, Wo, C)


# ----------------------------------------------------------------------------
# VGGBlock3D: conv3x3 -> GN -> ReLU -> conv3x3 -> GN -> ReLU
# ----------------------------------------------------------------------------
def vgg_block3d(x, p):
    N, D, H, W, _ = x.shape
    y = conv3d_3x3(x, p['w1'], p['b1'])
    C = y.shape[-1]
    y = groupnorm_relu(y.reshape(N, D * H * W, C), p['g1'], p['be1'])
    y = y.reshape(N, D, H, W, C)
    y = conv3d_3x3(y, p['w2'], p['b2'])
    C = y.shape[-1]
    y = groupnorm_relu(y.reshape(N, D * H * W, C), p['g2'], p['be2'])
    return y.reshape(N, D, H, W, C)


# ----------------------------------------------------------------------------
# Unet_beta3D forward
# ----------------------------------------------------------------------------
def build_block_configs(input_feature_channel, skip_connection,
                        middle_conv_channel, final_conv_channel):
    assert (len(input_feature_channel) == len(skip_connection) + 1
            == len(middle_conv_channel) + 1 == len(final_conv_channel) + 1)
    cfgs = []
    in_c = input_feature_channel[-1]
    skip_c = input_feature_channel[-2]
    c = in_c + skip_c if skip_connection[-1] else in_c
    cfgs.append((c, middle_conv_channel[-1], final_conv_channel[-1]))
    for index in range(len(skip_connection) - 1):
        in_c = final_conv_channel[-(index + 1)]
        skip_c = input_feature_channel[-(index + 3)]
        flag = skip_connection[-(index + 2)]
        c = in_c + skip_c if flag else in_c
        cfgs.append((c, middle_conv_channel[-(index + 2)],
                     final_conv_channel[-(index + 2)]))
    return cfgs


def unet_beta3d_forward(x_ncdhw, params, backbone, skip_connection):
    x = jnp.transpose(x_ncdhw, (0, 2, 3, 4, 1))        # NCDHW -> NDHWC
    feats = backbone(x)                                # list of NDHWC features
    xs = [x] + feats                                   # matches `x = input + backboneF`

    f_list = []
    # first decoder stage (deepest feature, skip_connection[-1])
    tgt = xs[-2].shape[1:4]
    up = trilinear_upsample(xs[-1], tgt)
    inp = jnp.concatenate([xs[-2], up], axis=-1) if skip_connection[-1] else up
    up_f = vgg_block3d(inp, params['blocks'][0])
    f_list.append(up_f)

    # remaining decoder stages
    for index in range(len(skip_connection) - 1):
        tgt = xs[-(index + 3)].shape[1:4]
        up = trilinear_upsample(up_f, tgt)
        if skip_connection[-(index + 2)]:
            inp = jnp.concatenate([xs[-(index + 3)], up], axis=-1)
        else:
            inp = up
        up_f = vgg_block3d(inp, params['blocks'][index + 1])
        f_list.append(up_f)

    # seg head at full input resolution
    tgt = xs[0].shape[1:4]
    up = trilinear_upsample(up_f, tgt)
    seg = conv3d_1x1(up, params['seg_w'], params['seg_b'])

    return dict(segout=jnp.transpose(seg, (0, 4, 1, 2, 3)),
                f_list=[jnp.transpose(f, (0, 4, 1, 2, 3)) for f in f_list])


# ----------------------------------------------------------------------------
# Deterministic parameter / synthetic backbone construction
# ----------------------------------------------------------------------------
def _init_conv3(key, cin, cout):
    k1, k2 = jax.random.split(key)
    fan_in = 27 * cin
    w = jax.random.normal(k1, (3, 3, 3, cin, cout), jnp.float32) / jnp.sqrt(fan_in)
    b = 0.1 * jax.random.normal(k2, (cout,), jnp.float32)
    return w, b


def init_params(key, cfgs, seg_in, out_ch):
    params = {'blocks': []}
    for (cin, cmid, cout) in cfgs:
        key, k1, k2 = jax.random.split(key, 3)
        w1, b1 = _init_conv3(k1, cin, cmid)
        w2, b2 = _init_conv3(k2, cmid, cout)
        params['blocks'].append(dict(
            w1=w1, b1=b1,
            g1=jnp.ones((cmid,), jnp.float32), be1=jnp.zeros((cmid,), jnp.float32),
            w2=w2, b2=b2,
            g2=jnp.ones((cout,), jnp.float32), be2=jnp.zeros((cout,), jnp.float32)))
    key, ks, kb = jax.random.split(key, 3)
    params['seg_w'] = jax.random.normal(ks, (seg_in, out_ch), jnp.float32) / jnp.sqrt(seg_in)
    params['seg_b'] = 0.1 * jax.random.normal(kb, (out_ch,), jnp.float32)
    return params


def make_backbone(key, cin, channels):
    # The real backbone is an external injected nn.Module; here we use a tiny
    # deterministic synthetic one (strided average pooling + channel projection).
    # TODO(synk): plug in a real backbone; only its output features feed this decoder.
    ws = []
    for c in channels:
        key, sub = jax.random.split(key)
        ws.append(jax.random.normal(sub, (cin, c), jnp.float32) * 0.5)

    def backbone(x):                                    # x: (N, D, H, W, Cin)
        feats = []
        pooled = x
        for w in ws:
            N, D, H, W, C = pooled.shape
            pooled = pooled.reshape(N, D // 2, 2, H // 2, 2, W // 2, 2, C).mean(axis=(2, 4, 6))
            feats.append(jnp.tanh(jnp.einsum('ndhwc,co->ndhwo', pooled, w)))
        return feats

    return backbone


# ----------------------------------------------------------------------------
if __name__ == "__main__":
    key = jax.random.PRNGKey(0)
    k_x, k_bb, k_p = jax.random.split(key, 3)

    # small, GroupNorm(8)-compatible configuration
    output_channel = 2
    input_feature_channel = [16, 16, 32]
    skip_connection = [True, True]
    middle_conv_channel = [16, 16]
    final_conv_channel = [16, 16]

    # input volume, PyTorch NCDHW
    x = jax.random.normal(k_x, (2, 1, 16, 16, 16), jnp.float32)

    backbone = make_backbone(k_bb, cin=1, channels=input_feature_channel)
    cfgs = build_block_configs(input_feature_channel, skip_connection,
                               middle_conv_channel, final_conv_channel)
    params = init_params(k_p, cfgs, final_conv_channel[0], output_channel)

    out = unet_beta3d_forward(x, params, backbone, skip_connection)
    jax.block_until_ready(out['segout'])
    for f in out['f_list']:
        jax.block_until_ready(f)

    assert out['segout'].shape == (2, output_channel, 16, 16, 16)
    assert out['f_list'][0].shape == (2, final_conv_channel[-1], 4, 4, 4)
    assert out['f_list'][1].shape == (2, final_conv_channel[-2], 8, 8, 8)
    print("KERNEL_OK")
</pallas_src>

<mosaic_0001>
module attributes {stable_mosaic.version = 11 : i64} {
  func.func @_bmm_kernel(%arg0: i32, %arg1: memref<4x2xf32, #tpu.memory_space<vmem>>, %arg2: memref<1x2x128xf32, #tpu.memory_space<vmem>>, %arg3: memref<1x4x128xf32, #tpu.memory_space<vmem>>) attributes {dimension_semantics = [#tpu.dimension_semantics<parallel>], iteration_bounds = array<i64: 2>, scalar_prefetch = 0 : i64, scratch_operands = 0 : i64, tpu.core_type = #tpu.core_type<tc>, window_params = [{pipeline_mode = #tpu.pipeline_mode<synchronous>, transform_indices = @transform_0, window_bounds = array<i64: 4, 2>}, {transform_indices = @transform_1, window_bounds = array<i64: 1, 2, 128>}, {transform_indices = @transform_2, window_bounds = array<i64: 1, 4, 128>}]} {
    %c0 = arith.constant 0 : index
    %c0_0 = arith.constant 0 : index
    %0 = vector.load %arg1[%c0, %c0_0] : memref<4x2xf32, #tpu.memory_space<vmem>>, vector<4x2xf32>
    %c0_1 = arith.constant 0 : index
    %c0_2 = arith.constant 0 : index
    %c0_3 = arith.constant 0 : index
    %1 = vector.load %arg2[%c0_1, %c0_2, %c0_3] : memref<1x2x128xf32, #tpu.memory_space<vmem>>, vector<1x2x128xf32>
    %2 = vector.shape_cast %1 : vector<1x2x128xf32> to vector<2x128xf32>
    %cst = arith.constant dense<0.000000e+00> : vector<4x128xf32>
    %3 = tpu.matmul %0, %2, %cst {dimension_numbers = #tpu.dot_dimension_numbers<[1], [0], [0], [1], [0, 0, 1, 1], [], []>} : vector<4x2xf32>, vector<2x128xf32>, vector<4x128xf32> -> vector<4x128xf32>
    %c0_4 = arith.constant 0 : index
    %c0_5 = arith.constant 0 : index
    %c0_6 = arith.constant 0 : index
    %4 = vector.load %arg3[%c0_4, %c0_5, %c0_6] : memref<1x4x128xf32, #tpu.memory_space<vmem>>, vector<1x4x128xf32>
    %5 = vector.shape_cast %4 : vector<1x4x128xf32> to vector<4x128xf32>
    %6 = vector.shape_cast %3 : vector<4x128xf32> to vector<1x4x128xf32>
    tpu.vector_store %arg3[%c0_4, %c0_5, %c0_6], %6 {strides = array<i32>} : memref<1x4x128xf32, #tpu.memory_space<vmem>>, vector<1x4x128xf32>,
    return
  }
  func.func @transform_0(%arg0: i32) -> (i32, i32) {
    %c0_i32 = arith.constant 0 : i32
    %c0_i32_0 = arith.constant 0 : i32
    %c0_i32_1 = arith.constant 0 : i32
    return %c0_i32, %c0_i32_0 : i32, i32
  }
  func.func @transform_1(%arg0: i32) -> (i32, i32, i32) {
    %c0_i32 = arith.constant 0 : i32
    %c0_i32_0 = arith.constant 0 : i32
    %c0_i32_1 = arith.constant 0 : i32
    return %arg0, %c0_i32, %c0_i32_0 : i32, i32, i32
  }
  func.func @transform_2(%arg0: i32) -> (i32, i32, i32) {
    %c0_i32 = arith.constant 0 : i32
    %c0_i32_0 = arith.constant 0 : i32
    %c0_i32_1 = arith.constant 0 : i32
    return %arg0, %c0_i32, %c0_i32_0 : i32, i32, i32
  }
}

</mosaic_0001>

<bundles_post_ra>
// kernel: tpu_custom_call.1
= control target key start
LH: loop header
LB: loop body
LE: loop exit
PB: predicated region body
PF: predicated region fallthrough
CT: control target
= control target key end

     0   :  { %7 = vsyncpa [#allocation3], 0  ;;  %s463_s0 = inlined_call_operand.vmem [shape: f32[4,2], index: 0, kind: input, shape index: {}]   ;;  %s464_s1 = inlined_call_operand.vmem [shape: f32[2,2,128], index: 1, kind: input, shape index: {}]   ;;  %s465_s2 = inlined_call_operand.hbm [shape: f32[2,4,128], index: 2, kind: output, shape index: {}]  }
   0x1   :  { %9 = vsyncpa [#allocation3 + $0x1], 0  ;;  %s375_s9 = smov 0   ;;  %s377_s10 = smov 0  }
   0x2   :  { %s379_s11 = smov 0   ;;  %s381_s12 = smov 0  }
   0x3 LB: > { %s396_s13 = sadd.s32 4294967295, %s358_s12   ;;  %s245_s14 = sadd.s32 4294967294, %s358_s12   ;;  %s358_s12 = sphi %s381_s12, %s471_s12   ;;  %s354_s11 = sphi %s379_s11, %s470_s11   ;;  %s350_s10 = sphi %s377_s10, %s469_s10   ;;  %s346_s9 = sphi %s375_s9, %s468_s9  }
   0x4   : > { %s400_s15 = sadd.s32 1, %s358_s12   ;;  %s69_s16 = sadd.s32 1, %s354_s11 }
   0x5   : > { %s66_s17 = ssub.s32 %s358_s12, %s400_s15  ;;  %p79_p0 = scmp.ne.s32.totalorder %s354_s11, %s350_s10 }
   0x6   : > { %p67_p1 = scmp.eq.s32.totalorder %s66_s17, 0  ;;  %p80_p2 = scmp.eq.s32.totalorder %s396_s13, 1 }
   0x7   : > { %p85_p3 = scmp.ne.s32.totalorder %s350_s10, %s346_s9  ;;  %p86_p4 = scmp.eq.s32.totalorder %s245_s14, 1 }
   0x8   : > { %s411_s18 = scalar_select %p67_p1, %s354_s11, %s69_s16  }
   0x9   : > { %p413_p5 = por %p80_p2, %p79_p0  ;;  %p417_p6 = por %p86_p4, %p85_p3 }
   0xa   : > { %p248_p7 = scmp.ge.s32.totalorder %s358_s12, 1  ;;  %p114_p8 = scmp.lt.s32.totalorder %s358_s12, 3 }
   0xc   : > { %p115_p9 = pnand %p248_p7, %p114_p8 }
   0xd   : > { %p135_p10 = scmp.lt.s32.totalorder (!%p115_p9), %s396_s13, 1  ;;  %s132_s28 = sand.u32 (!%p115_p9), 1, %s350_s10  }
   0xe   : > { %118 = sbr.rel (%p115_p9) target bundleno = 154 (0x9a), region = 28  ;;  %s249_s29 = sshll.u32 (!%p115_p9), %s132_s28, 2 }
   0xf   : > { %s254_s30 = sshll.u32 (!%p115_p9), %s396_s13, 2  ;;  %s134_s6 = scalar_lea.vmem (!%p115_p9), [#allocation2], %s249_s29 }
  0x10   : > { %s181_s5 = scalar_lea.hbm (!%p115_p9), %s465_s2, %s254_s30  ;;  %s183_s7 = sshll.u32 (!%p115_p9), %s134_s6, 4  ;;  %s184_s7 = int_to_ptr.vmem [resolvable:$true] %s183_s7 }
  0x11   : > { %s185_s8 = sshll.u32 (!%p115_p9), %s181_s5, 4  ;;  %s171_s14 = scalar_lea.sflag (!%p115_p9), [#allocation3], %s132_s28  ;;  %s186_s8 = int_to_ptr.hbm [resolvable:$true] %s185_s8 }
  0x12   : > { %s310_s16 = sshra.s32 (!%p115_p9), %s186_s8, 4  ;;  %s311_s16 = int_to_ptr.hbm [resolvable:$true] %s310_s16 }
  0x13   : > { %s136_s21 = scalar_select %p135_p10, %s396_s13, 1  ;;  %vm145_vm0 = vcmask 1041408   ;;  %v139_v0 = vld [vmem:[%s463_s0] sm:$0xf]  ;;  %vm141_vm1 = vcmask 15360  }
  0x14   : > { %s312_s17 = scalar_lea.hbm %s311_s16, 4  ;;  %p317_p0 = scmp.lt.s32.totalorder %s311_s16, %s465_s2 }
  0x15   : > { %s250_s22 = sshll.u32 %s136_s21, 1  ;;  %p313_p11 = scmp.ne.s32.totalorder %s311_s16, %s312_s17 }
  0x16   : > { %s138_s25 = scalar_lea.vmem %s464_s1, %s250_s22  ;;  %s316_s22 = scalar_lea.hbm %s465_s2, 8 }
  0x17   : > { %v140_v1 = vld [vmem:[%s138_s25] sm:$0x3]  ;;  %p314_p12 = pnand %p313_p11, %p413_p5  ;;  %p318_p1 = scmp.lt.s32.totalorder %s316_s22, %s312_s17 }
  0x18   : > { %251 = vmatpush.msk.msra.mxu0 %vm145_vm0, %v140_v1 }
  0x19   : > { %252 = vmatmul.msk.f32.vlgmr.msra.gmra.mxu0 %vm141_vm1, %v139_v0  ;;  %p315_p13 = pneg %p314_p12  ;;  %p319_p2 = por %p318_p1, %p317_p0 }
  0x1b   : > { %p320_p3 = pnand %p319_p2, %p315_p13 }
  0x96   : > { %v166_v2 = vpop.f32.mrf.mxu0 }
  0x97   : > { %169 = vst [vmem:[%s134_s6] sm:$0xf] %v166_v2 }
  0x98   : > { %323 = shalt.err (!%p320_p3)
}
  0x99   : > { %257 = dma.vmem_to_hbm [thread:$0]  (%p413_p5), %s184_s7, 64, %s186_s8, %s171_s14  }
  0x9a PF: > { %p263_p4 = scmp.ge.s32.totalorder %s358_s12, 2  ;;  %s197_s25 = sand.u32 1, %s346_s9  }
  0x9b   : > { %s198_s26 = scalar_lea.sflag [#allocation3], %s197_s25 }
  0x9c   : > { %p260_p7 = pnand %p263_p4, %p417_p6 }
  0x9e   : > { %p261_p8 = pneg %p260_p7 }
  0xa0   : > { %341 = dma.done.wait (%p261_p8), %s198_s26, 64  }
  0xa1   : > { %343 = vsyncadd (%p261_p8), %s198_s26, 4294967232  ;;  %p12_p9 = scmp.ge.s32.totalorder %s400_s15, 4   ;;  %s468_s9 = smov %s350_s10 }
  0xa2   : > { %s469_s10 = smov %s354_s11  ;;  %s470_s11 = smov %s411_s18 }
  0xa3   : > { %s471_s12 = smov %s400_s15  ;;  %14 = sbr.rel (!%p12_p9) target bundleno = 3 (0x3), region = 63 }
  0xa8   :  { %204 = vsyncpa [#allocation3], 1 }
  0xa9   :  { %206 = vsyncpa [#allocation3 + $0x1], 1 }

</bundles_post_ra>
